<compile_context>
chip_gen: v5e
topology: v5e:2x2
jax: 0.10.0
libtpu: 0.0.40
codegen_flags: <defaults>
</compile_context>

<pallas_src>
import functools

import jax
import jax.numpy as jnp
from jax.experimental import pallas as pl
from jax.experimental.pallas import tpu as pltpu

block_size = 32     # max sequence length (causal mask buffer size in PyTorch)
dropout = 0.1       # unused in eval mode
n_embd = 128        # embedding dim C


def _mha_kernel(x_ref, wqkv_ref, wproj_ref, bproj_ref, o_ref, *,
                num_heads, head_size):
    # x_ref:     (G, T, C)      bf16   G batch elements per grid step
    # wqkv_ref:  (C, 3*NH*H)    bf16   fused [Q | K | V] projection weights
    # wproj_ref: (NH*H, C)      bf16   output projection weight
    # bproj_ref: (1, C)         f32    output projection bias
    # o_ref:     (G, T, C)      f32
    G, T, C = x_ref.shape
    H = head_size
    D = num_heads * head_size

    # ---- fused QKV projection: one MXU pass, M = G*T, N = 3*NH*H ----
    x2 = x_ref[...].reshape(G * T, C)                                   # bf16
    qkv = jnp.dot(x2, wqkv_ref[...],
                  preferred_element_type=jnp.float32)                   # (G*T, 3D) f32

    # causal mask with a finite sentinel: padded / fully-masked rows degrade
    # to uniform junk (later sliced off) instead of NaN-poisoning.
    row = jax.lax.broadcasted_iota(jnp.int32, (T, T), 0)
    col = jax.lax.broadcasted_iota(jnp.int32, (T, T), 1)
    causal = (col <= row)[None, :, :]                                    # (1, T, T)
    scale = C ** -0.5          # spec scales by C (= n_embd), not head_size

    head_outs = []
    for h in range(num_heads):            # static, small loop over heads
        q = qkv[:, h * H:(h + 1) * H].reshape(G, T, H)
        k = qkv[:, D + h * H:D + (h + 1) * H].reshape(G, T, H)
        v = qkv[:, 2 * D + h * H:2 * D + (h + 1) * H].reshape(G, T, H)

        # scores: contract the head dim directly (no explicit k transpose)
        s = jnp.einsum('bqh,bkh->bqk',
                       q.astype(jnp.bfloat16), k.astype(jnp.bfloat16),
                       preferred_element_type=jnp.float32) * scale      # (G, T, T)
        s = jnp.where(causal, s, jnp.float32(-1e30))

        # softmax in f32; reciprocal of the denominator on the EUP
        s = s - jnp.max(s, axis=-1, keepdims=True)
        p = jnp.exp(s)
        p = p * pl.reciprocal(jnp.sum(p, axis=-1, keepdims=True), approx=True)

        # attention dropout is identity in eval mode
        head_outs.append(
            jnp.einsum('bqk,bkh->bqh',
                       p.astype(jnp.bfloat16), v.astype(jnp.bfloat16),
                       preferred_element_type=jnp.float32))              # (G, T, H)

    # concat heads -> lane-dense (G*T, NH*H), then fused output projection
    cat = jnp.concatenate(head_outs, axis=-1).reshape(G * T, D)
    out = jnp.dot(cat.astype(jnp.bfloat16), wproj_ref[...],
                  preferred_element_type=jnp.float32)                    # (G*T, C)
    out = out + bproj_ref[...]                                           # bias (f32)
    # output dropout is identity in eval mode
    o_ref[...] = out.reshape(G, T, C).astype(o_ref.dtype)


def multi_head_attention(x, w_key, w_query, w_value, w_proj, b_proj, *,
                         batch_block=None):
    """Eval-mode MultiHeadAttention forward.

    x:        (B, T, C) float32
    w_key / w_query / w_value: (NH, H, C)  stacked per-head nn.Linear weights
    w_proj:   (C, NH*H)  output-projection nn.Linear weight
    b_proj:   (C,)       output-projection bias
    """
    B, T, C = x.shape
    NH, H, _ = w_key.shape
    D = NH * H
    assert C == n_embd and T <= block_size and D == C
    out_dtype = x.dtype

    if batch_block is None:
        # Fold the whole batch into one grid step: at small B*T the kernel is
        # launch/overhead bound.  For large B on v7x, pick batch_block so the
        # grid keeps >= 2 "parallel" steps (both TensorCores get work) and a
        # double-buffered block still fits its 64 MiB VMEM.
        batch_block = B
    assert B % batch_block == 0

    # Fused [Q | K | V] weights: column h*H + j of each section is head h's
    # j-th output feature, matching torch.cat([h(x) for h in heads], dim=-1).
    def fuse(w):                                   # (NH, H, C) -> (C, NH*H)
        return jnp.transpose(w, (2, 0, 1)).reshape(C, D)

    wqkv = jnp.concatenate([fuse(w_query), fuse(w_key), fuse(w_value)],
                           axis=1).astype(jnp.bfloat16)      # (C, 3D)
    wproj = w_proj.T.astype(jnp.bfloat16)                    # (D, C)
    bproj = b_proj.reshape(1, C).astype(jnp.float32)
    x_bf16 = x.astype(jnp.bfloat16)                          # halve x DMA bytes

    kernel = functools.partial(_mha_kernel, num_heads=NH, head_size=H)
    return pl.pallas_call(
        kernel,
        out_shape=jax.ShapeDtypeStruct((B, T, C), out_dtype),
        grid=(B // batch_block,),
        in_specs=[
            pl.BlockSpec((batch_block, T, C), lambda b: (b, 0, 0)),   # x
            pl.BlockSpec((C, 3 * D), lambda b: (0, 0)),               # Wqkv
            pl.BlockSpec((D, C), lambda b: (0, 0)),                   # Wproj
            pl.BlockSpec((1, C), lambda b: (0, 0)),                   # bias
        ],
        out_specs=pl.BlockSpec((batch_block, T, C), lambda b: (b, 0, 0)),
        compiler_params=pltpu.CompilerParams(
            dimension_semantics=("parallel",)),
    )(x_bf16, wqkv, wproj, bproj)


def mha_reference(x, w_key, w_query, w_value, w_proj, b_proj,
                  matmul_dtype=jnp.float32):
    """Pure-JAX reference matching the PyTorch forward (eval mode).

    matmul_dtype=jnp.bfloat16 reproduces the kernel's mixed precision
    (bf16 MXU operands, f32 accumulation) for a tight comparison.
    """
    B, T, C = x.shape
    NH = w_key.shape[0]

    def mm(a, b):
        return jnp.matmul(a.astype(matmul_dtype), b.astype(matmul_dtype),
                          preferred_element_type=jnp.float32)

    tril = jnp.tril(jnp.ones((T, T)))
    heads = []
    for h in range(NH):
        k = mm(x, w_key[h].T)
        q = mm(x, w_query[h].T)
        v = mm(x, w_value[h].T)
        wei = mm(q, jnp.swapaxes(k, -2, -1)) * (C ** -0.5)
        wei = jnp.where(tril == 0, -jnp.inf, wei)
        wei = jax.nn.softmax(wei, axis=-1)
        heads.append(mm(wei, v))
    cat = jnp.concatenate(heads, axis=-1)
    return mm(cat, w_proj.T) + b_proj


if __name__ == "__main__":
    B, T, C = 2, 8, n_embd
    num_heads, head_size = 4, 32        # num_heads * head_size == n_embd (lane-dense output)

    key = jax.random.PRNGKey(0)
    kx, kk, kq, kv, kp, kb = jax.random.split(key, 6)

    x = jax.random.normal(kx, (B, T, C), dtype=jnp.float32)
    w_key = jax.random.normal(kk, (num_heads, head_size, C), jnp.float32) * C ** -0.5
    w_query = jax.random.normal(kq, (num_heads, head_size, C), jnp.float32) * C ** -0.5
    w_value = jax.random.normal(kv, (num_heads, head_size, C), jnp.float32) * C ** -0.5
    w_proj = jax.random.normal(kp, (C, num_heads * head_size), jnp.float32) \
        * (num_heads * head_size) ** -0.5
    b_proj = jax.random.normal(kb, (C,), jnp.float32) * 0.1

    out = multi_head_attention(x, w_key, w_query, w_value, w_proj, b_proj)
    out = jax.block_until_ready(out)
    assert out.shape == (B, T, C)

    # Tight check against a reference using the SAME mixed precision as the
    # kernel (bf16 MXU operands, f32 accumulation, f32 softmax).
    ref_mp = mha_reference(x, w_key, w_query, w_value, w_proj, b_proj,
                           matmul_dtype=jnp.bfloat16)
    assert jnp.allclose(out, ref_mp, atol=1e-2, rtol=1e-2), \
        "mismatch vs mixed-precision reference"

    # Looser sanity check against exact f32 PyTorch semantics (tolerance
    # re-baselined for bf16 MXU inputs, per review).
    ref_f32 = mha_reference(x, w_key, w_query, w_value, w_proj, b_proj)
    assert jnp.allclose(out, ref_f32, atol=1e-1, rtol=1e-1), \
        "mismatch vs f32 reference"

    print("KERNEL_OK")
</pallas_src>

<mosaic_0001>
module attributes {stable_mosaic.version = 11 : i64} {
  func.func @_mha_kernel(%arg0: i32, %arg1: memref<2x8x128xbf16, #tpu.memory_space<vmem>>, %arg2: memref<128x384xbf16, #tpu.memory_space<vmem>>, %arg3: memref<128x128xbf16, #tpu.memory_space<vmem>>, %arg4: memref<1x128xf32, #tpu.memory_space<vmem>>, %arg5: memref<2x8x128xf32, #tpu.memory_space<vmem>>) attributes {dimension_semantics = [#tpu.dimension_semantics<parallel>], iteration_bounds = array<i64: 1>, scalar_prefetch = 0 : i64, scratch_operands = 0 : i64, tpu.core_type = #tpu.core_type<tc>, window_params = [{transform_indices = @transform_0, window_bounds = array<i64: 2, 8, 128>}, {pipeline_mode = #tpu.pipeline_mode<synchronous>, transform_indices = @transform_1, window_bounds = array<i64: 128, 384>}, {pipeline_mode = #tpu.pipeline_mode<synchronous>, transform_indices = @transform_2, window_bounds = array<i64: 128, 128>}, {pipeline_mode = #tpu.pipeline_mode<synchronous>, transform_indices = @transform_3, window_bounds = array<i64: 1, 128>}, {transform_indices = @transform_4, window_bounds = array<i64: 2, 8, 128>}]} {
    %c0 = arith.constant 0 : index
    %c0_0 = arith.constant 0 : index
    %c0_1 = arith.constant 0 : index
    %0 = vector.load %arg1[%c0, %c0_0, %c0_1] : memref<2x8x128xbf16, #tpu.memory_space<vmem>>, vector<2x8x128xbf16>
    %1 = vector.shape_cast %0 : vector<2x8x128xbf16> to vector<16x128xbf16>
    %c0_2 = arith.constant 0 : index
    %c0_3 = arith.constant 0 : index
    %2 = vector.load %arg2[%c0_2, %c0_3] : memref<128x384xbf16, #tpu.memory_space<vmem>>, vector<128x384xbf16>
    %cst = arith.constant dense<0.000000e+00> : vector<16x384xf32>
    %3 = tpu.matmul %1, %2, %cst {dimension_numbers = #tpu.dot_dimension_numbers<[1], [0], [0], [1], [0, 0, 1, 1], [], []>} : vector<16x128xbf16>, vector<128x384xbf16>, vector<16x384xf32> -> vector<16x384xf32>
    %4 = tpu.iota {dimensions = array<i32: 0>} : vector<8x8xi32>
    %5 = tpu.iota {dimensions = array<i32: 1>} : vector<8x8xi32>
    %6 = arith.cmpi sle, %5, %4 : vector<8x8xi32>
    %7 = vector.shape_cast %6 : vector<8x8xi1> to vector<1x8x8xi1>
    %8 = vector.extract_strided_slice %3 {offsets = [0, 0], sizes = [16, 32], strides = [1, 1]} : vector<16x384xf32> to vector<16x32xf32>
    %9 = vector.shape_cast %8 : vector<16x32xf32> to vector<2x8x32xf32>
    %10 = vector.extract_strided_slice %3 {offsets = [0, 128], sizes = [16, 32], strides = [1, 1]} : vector<16x384xf32> to vector<16x32xf32>
    %11 = vector.shape_cast %10 : vector<16x32xf32> to vector<2x8x32xf32>
    %12 = vector.extract_strided_slice %3 {offsets = [0, 256], sizes = [16, 32], strides = [1, 1]} : vector<16x384xf32> to vector<16x32xf32>
    %13 = vector.shape_cast %12 : vector<16x32xf32> to vector<2x8x32xf32>
    %14 = arith.truncf %9 : vector<2x8x32xf32> to vector<2x8x32xbf16>
    %15 = arith.truncf %11 : vector<2x8x32xf32> to vector<2x8x32xbf16>
    "tpu.trace_start"() <{level = 10 : i32, message = "bqh,bkh->bqk"}> : () -> ()
    %cst_4 = arith.constant dense<0.000000e+00> : vector<2x8x8xf32>
    %16 = tpu.matmul %14, %15, %cst_4 {dimension_numbers = #tpu.dot_dimension_numbers<[2], [2], [1], [1], [0, 0, 0, 1, 1, 1], [0], [0]>} : vector<2x8x32xbf16>, vector<2x8x32xbf16>, vector<2x8x8xf32> -> vector<2x8x8xf32>
    "tpu.trace_stop"() : () -> ()
    %cst_5 = arith.constant 0.0883883461 : f32
    %17 = vector.broadcast %cst_5 : f32 to vector<2x8x8xf32>
    %18 = arith.mulf %16, %17 : vector<2x8x8xf32>
    %cst_6 = arith.constant -1.000000e+30 : f32
    %19 = vector.shape_cast %7 : vector<1x8x8xi1> to vector<1x8x8xi1>
    %20 = vector.broadcast %19 : vector<1x8x8xi1> to vector<2x8x8xi1>
    %21 = vector.broadcast %cst_6 : f32 to vector<2x8x8xf32>
    %22 = arith.select %20, %18, %21 : vector<2x8x8xi1>, vector<2x8x8xf32>
    %cst_7 = arith.constant dense<0xFF800000> : vector<2x8xf32>
    %23 = vector.multi_reduction <maximumf>, %22, %cst_7 [2] : vector<2x8x8xf32> to vector<2x8xf32>
    %24 = vector.shape_cast %23 : vector<2x8xf32> to vector<2x8x1xf32>
    %25 = vector.broadcast %24 : vector<2x8x1xf32> to vector<2x8x8xf32>
    %26 = arith.subf %22, %25 : vector<2x8x8xf32>
    %27 = math.exp %26 : vector<2x8x8xf32>
    %cst_8 = arith.constant dense<0.000000e+00> : vector<2x8xf32>
    %28 = vector.multi_reduction <add>, %27, %cst_8 [2] : vector<2x8x8xf32> to vector<2x8xf32>
    %29 = vector.shape_cast %28 : vector<2x8xf32> to vector<2x8x1xf32>
    %30 = tpu.reciprocal %29 {approx = true} : vector<2x8x1xf32> -> vector<2x8x1xf32>
    %31 = vector.broadcast %30 : vector<2x8x1xf32> to vector<2x8x8xf32>
    %32 = arith.mulf %27, %31 : vector<2x8x8xf32>
    %33 = arith.truncf %32 : vector<2x8x8xf32> to vector<2x8x8xbf16>
    %34 = arith.truncf %13 : vector<2x8x32xf32> to vector<2x8x32xbf16>
    "tpu.trace_start"() <{level = 10 : i32, message = "bqk,bkh->bqh"}> : () -> ()
    %cst_9 = arith.constant dense<0.000000e+00> : vector<2x8x32xf32>
    %35 = tpu.matmul %33, %34, %cst_9 {dimension_numbers = #tpu.dot_dimension_numbers<[2], [1], [1], [2], [0, 0, 0, 1, 1, 2], [0], [0]>} : vector<2x8x8xbf16>, vector<2x8x32xbf16>, vector<2x8x32xf32> -> vector<2x8x32xf32>
    "tpu.trace_stop"() : () -> ()
    %36 = vector.extract_strided_slice %3 {offsets = [0, 32], sizes = [16, 32], strides = [1, 1]} : vector<16x384xf32> to vector<16x32xf32>
    %37 = vector.shape_cast %36 : vector<16x32xf32> to vector<2x8x32xf32>
    %38 = vector.extract_strided_slice %3 {offsets = [0, 160], sizes = [16, 32], strides = [1, 1]} : vector<16x384xf32> to vector<16x32xf32>
    %39 = vector.shape_cast %38 : vector<16x32xf32> to vector<2x8x32xf32>
    %40 = vector.extract_strided_slice %3 {offsets = [0, 288], sizes = [16, 32], strides = [1, 1]} : vector<16x384xf32> to vector<16x32xf32>
    %41 = vector.shape_cast %40 : vector<16x32xf32> to vector<2x8x32xf32>
    %42 = arith.truncf %37 : vector<2x8x32xf32> to vector<2x8x32xbf16>
    %43 = arith.truncf %39 : vector<2x8x32xf32> to vector<2x8x32xbf16>
    "tpu.trace_start"() <{level = 10 : i32, message = "bqh,bkh->bqk"}> : () -> ()
    %cst_10 = arith.constant dense<0.000000e+00> : vector<2x8x8xf32>
    %44 = tpu.matmul %42, %43, %cst_10 {dimension_numbers = #tpu.dot_dimension_numbers<[2], [2], [1], [1], [0, 0, 0, 1, 1, 1], [0], [0]>} : vector<2x8x32xbf16>, vector<2x8x32xbf16>, vector<2x8x8xf32> -> vector<2x8x8xf32>
    "tpu.trace_stop"() : () -> ()
    %cst_11 = arith.constant 0.0883883461 : f32
    %45 = vector.broadcast %cst_11 : f32 to vector<2x8x8xf32>
    %46 = arith.mulf %44, %45 : vector<2x8x8xf32>
    %cst_12 = arith.constant -1.000000e+30 : f32
    %47 = vector.shape_cast %7 : vector<1x8x8xi1> to vector<1x8x8xi1>
    %48 = vector.broadcast %47 : vector<1x8x8xi1> to vector<2x8x8xi1>
    %49 = vector.broadcast %cst_12 : f32 to vector<2x8x8xf32>
    %50 = arith.select %48, %46, %49 : vector<2x8x8xi1>, vector<2x8x8xf32>
    %cst_13 = arith.constant dense<0xFF800000> : vector<2x8xf32>
    %51 = vector.multi_reduction <maximumf>, %50, %cst_13 [2] : vector<2x8x8xf32> to vector<2x8xf32>
    %52 = vector.shape_cast %51 : vector<2x8xf32> to vector<2x8x1xf32>
    %53 = vector.broadcast %52 : vector<2x8x1xf32> to vector<2x8x8xf32>
    %54 = arith.subf %50, %53 : vector<2x8x8xf32>
    %55 = math.exp %54 : vector<2x8x8xf32>
    %cst_14 = arith.constant dense<0.000000e+00> : vector<2x8xf32>
    %56 = vector.multi_reduction <add>, %55, %cst_14 [2] : vector<2x8x8xf32> to vector<2x8xf32>
    %57 = vector.shape_cast %56 : vector<2x8xf32> to vector<2x8x1xf32>
    %58 = tpu.reciprocal %57 {approx = true} : vector<2x8x1xf32> -> vector<2x8x1xf32>
    %59 = vector.broadcast %58 : vector<2x8x1xf32> to vector<2x8x8xf32>
    %60 = arith.mulf %55, %59 : vector<2x8x8xf32>
    %61 = arith.truncf %60 : vector<2x8x8xf32> to vector<2x8x8xbf16>
    %62 = arith.truncf %41 : vector<2x8x32xf32> to vector<2x8x32xbf16>
    "tpu.trace_start"() <{level = 10 : i32, message = "bqk,bkh->bqh"}> : () -> ()
    %cst_15 = arith.constant dense<0.000000e+00> : vector<2x8x32xf32>
    %63 = tpu.matmul %61, %62, %cst_15 {dimension_numbers = #tpu.dot_dimension_numbers<[2], [1], [1], [2], [0, 0, 0, 1, 1, 2], [0], [0]>} : vector<2x8x8xbf16>, vector<2x8x32xbf16>, vector<2x8x32xf32> -> vector<2x8x32xf32>
    "tpu.trace_stop"() : () -> ()
    %64 = vector.extract_strided_slice %3 {offsets = [0, 64], sizes = [16, 32], strides = [1, 1]} : vector<16x384xf32> to vector<16x32xf32>
    %65 = vector.shape_cast %64 : vector<16x32xf32> to vector<2x8x32xf32>
    %66 = vector.extract_strided_slice %3 {offsets = [0, 192], sizes = [16, 32], strides = [1, 1]} : vector<16x384xf32> to vector<16x32xf32>
    %67 = vector.shape_cast %66 : vector<16x32xf32> to vector<2x8x32xf32>
    %68 = vector.extract_strided_slice %3 {offsets = [0, 320], sizes = [16, 32], strides = [1, 1]} : vector<16x384xf32> to vector<16x32xf32>
    %69 = vector.shape_cast %68 : vector<16x32xf32> to vector<2x8x32xf32>
    %70 = arith.truncf %65 : vector<2x8x32xf32> to vector<2x8x32xbf16>
    %71 = arith.truncf %67 : vector<2x8x32xf32> to vector<2x8x32xbf16>
    "tpu.trace_start"() <{level = 10 : i32, message = "bqh,bkh->bqk"}> : () -> ()
    %cst_16 = arith.constant dense<0.000000e+00> : vector<2x8x8xf32>
    %72 = tpu.matmul %70, %71, %cst_16 {dimension_numbers = #tpu.dot_dimension_numbers<[2], [2], [1], [1], [0, 0, 0, 1, 1, 1], [0], [0]>} : vector<2x8x32xbf16>, vector<2x8x32xbf16>, vector<2x8x8xf32> -> vector<2x8x8xf32>
    "tpu.trace_stop"() : () -> ()
    %cst_17 = arith.constant 0.0883883461 : f32
    %73 = vector.broadcast %cst_17 : f32 to vector<2x8x8xf32>
    %74 = arith.mulf %72, %73 : vector<2x8x8xf32>
    %cst_18 = arith.constant -1.000000e+30 : f32
    %75 = vector.shape_cast %7 : vector<1x8x8xi1> to vector<1x8x8xi1>
    %76 = vector.broadcast %75 : vector<1x8x8xi1> to vector<2x8x8xi1>
    %77 = vector.broadcast %cst_18 : f32 to vector<2x8x8xf32>
    %78 = arith.select %76, %74, %77 : vector<2x8x8xi1>, vector<2x8x8xf32>
    %cst_19 = arith.constant dense<0xFF800000> : vector<2x8xf32>
    %79 = vector.multi_reduction <maximumf>, %78, %cst_19 [2] : vector<2x8x8xf32> to vector<2x8xf32>
    %80 = vector.shape_cast %79 : vector<2x8xf32> to vector<2x8x1xf32>
    %81 = vector.broadcast %80 : vector<2x8x1xf32> to vector<2x8x8xf32>
    %82 = arith.subf %78, %81 : vector<2x8x8xf32>
    %83 = math.exp %82 : vector<2x8x8xf32>
    %cst_20 = arith.constant dense<0.000000e+00> : vector<2x8xf32>
    %84 = vector.multi_reduction <add>, %83, %cst_20 [2] : vector<2x8x8xf32> to vector<2x8xf32>
    %85 = vector.shape_cast %84 : vector<2x8xf32> to vector<2x8x1xf32>
    %86 = tpu.reciprocal %85 {approx = true} : vector<2x8x1xf32> -> vector<2x8x1xf32>
    %87 = vector.broadcast %86 : vector<2x8x1xf32> to vector<2x8x8xf32>
    %88 = arith.mulf %83, %87 : vector<2x8x8xf32>
    %89 = arith.truncf %88 : vector<2x8x8xf32> to vector<2x8x8xbf16>
    %90 = arith.truncf %69 : vector<2x8x32xf32> to vector<2x8x32xbf16>
    "tpu.trace_start"() <{level = 10 : i32, message = "bqk,bkh->bqh"}> : () -> ()
    %cst_21 = arith.constant dense<0.000000e+00> : vector<2x8x32xf32>
    %91 = tpu.matmul %89, %90, %cst_21 {dimension_numbers = #tpu.dot_dimension_numbers<[2], [1], [1], [2], [0, 0, 0, 1, 1, 2], [0], [0]>} : vector<2x8x8xbf16>, vector<2x8x32xbf16>, vector<2x8x32xf32> -> vector<2x8x32xf32>
    "tpu.trace_stop"() : () -> ()
    %92 = vector.extract_strided_slice %3 {offsets = [0, 96], sizes = [16, 32], strides = [1, 1]} : vector<16x384xf32> to vector<16x32xf32>
    %93 = vector.shape_cast %92 : vector<16x32xf32> to vector<2x8x32xf32>
    %94 = vector.extract_strided_slice %3 {offsets = [0, 224], sizes = [16, 32], strides = [1, 1]} : vector<16x384xf32> to vector<16x32xf32>
    %95 = vector.shape_cast %94 : vector<16x32xf32> to vector<2x8x32xf32>
    %96 = vector.extract_strided_slice %3 {offsets = [0, 352], sizes = [16, 32], strides = [1, 1]} : vector<16x384xf32> to vector<16x32xf32>
    %97 = vector.shape_cast %96 : vector<16x32xf32> to vector<2x8x32xf32>
    %98 = arith.truncf %93 : vector<2x8x32xf32> to vector<2x8x32xbf16>
    %99 = arith.truncf %95 : vector<2x8x32xf32> to vector<2x8x32xbf16>
    "tpu.trace_start"() <{level = 10 : i32, message = "bqh,bkh->bqk"}> : () -> ()
    %cst_22 = arith.constant dense<0.000000e+00> : vector<2x8x8xf32>
    %100 = tpu.matmul %98, %99, %cst_22 {dimension_numbers = #tpu.dot_dimension_numbers<[2], [2], [1], [1], [0, 0, 0, 1, 1, 1], [0], [0]>} : vector<2x8x32xbf16>, vector<2x8x32xbf16>, vector<2x8x8xf32> -> vector<2x8x8xf32>
    "tpu.trace_stop"() : () -> ()
    %cst_23 = arith.constant 0.0883883461 : f32
    %101 = vector.broadcast %cst_23 : f32 to vector<2x8x8xf32>
    %102 = arith.mulf %100, %101 : vector<2x8x8xf32>
    %cst_24 = arith.constant -1.000000e+30 : f32
    %103 = vector.shape_cast %7 : vector<1x8x8xi1> to vector<1x8x8xi1>
    %104 = vector.broadcast %103 : vector<1x8x8xi1> to vector<2x8x8xi1>
    %105 = vector.broadcast %cst_24 : f32 to vector<2x8x8xf32>
    %106 = arith.select %104, %102, %105 : vector<2x8x8xi1>, vector<2x8x8xf32>
    %cst_25 = arith.constant dense<0xFF800000> : vector<2x8xf32>
    %107 = vector.multi_reduction <maximumf>, %106, %cst_25 [2] : vector<2x8x8xf32> to vector<2x8xf32>
    %108 = vector.shape_cast %107 : vector<2x8xf32> to vector<2x8x1xf32>
    %109 = vector.broadcast %108 : vector<2x8x1xf32> to vector<2x8x8xf32>
    %110 = arith.subf %106, %109 : vector<2x8x8xf32>
    %111 = math.exp %110 : vector<2x8x8xf32>
    %cst_26 = arith.constant dense<0.000000e+00> : vector<2x8xf32>
    %112 = vector.multi_reduction <add>, %111, %cst_26 [2] : vector<2x8x8xf32> to vector<2x8xf32>
    %113 = vector.shape_cast %112 : vector<2x8xf32> to vector<2x8x1xf32>
    %114 = tpu.reciprocal %113 {approx = true} : vector<2x8x1xf32> -> vector<2x8x1xf32>
    %115 = vector.broadcast %114 : vector<2x8x1xf32> to vector<2x8x8xf32>
    %116 = arith.mulf %111, %115 : vector<2x8x8xf32>
    %117 = arith.truncf %116 : vector<2x8x8xf32> to vector<2x8x8xbf16>
    %118 = arith.truncf %97 : vector<2x8x32xf32> to vector<2x8x32xbf16>
    "tpu.trace_start"() <{level = 10 : i32, message = "bqk,bkh->bqh"}> : () -> ()
    %cst_27 = arith.constant dense<0.000000e+00> : vector<2x8x32xf32>
    %119 = tpu.matmul %117, %118, %cst_27 {dimension_numbers = #tpu.dot_dimension_numbers<[2], [1], [1], [2], [0, 0, 0, 1, 1, 2], [0], [0]>} : vector<2x8x8xbf16>, vector<2x8x32xbf16>, vector<2x8x32xf32> -> vector<2x8x32xf32>
    "tpu.trace_stop"() : () -> ()
    %120 = tpu.concatenate %35, %63, %91, %119 in 2 : vector<2x8x32xf32>, vector<2x8x32xf32>, vector<2x8x32xf32>, vector<2x8x32xf32> -> vector<2x8x128xf32>
    %121 = vector.shape_cast %120 : vector<2x8x128xf32> to vector<16x128xf32>
    %122 = arith.truncf %121 : vector<16x128xf32> to vector<16x128xbf16>
    %c0_28 = arith.constant 0 : index
    %c0_29 = arith.constant 0 : index
    %123 = vector.load %arg3[%c0_28, %c0_29] : memref<128x128xbf16, #tpu.memory_space<vmem>>, vector<128x128xbf16>
    %cst_30 = arith.constant dense<0.000000e+00> : vector<16x128xf32>
    %124 = tpu.matmul %122, %123, %cst_30 {dimension_numbers = #tpu.dot_dimension_numbers<[1], [0], [0], [1], [0, 0, 1, 1], [], []>} : vector<16x128xbf16>, vector<128x128xbf16>, vector<16x128xf32> -> vector<16x128xf32>
    %c0_31 = arith.constant 0 : index
    %c0_32 = arith.constant 0 : index
    %125 = vector.load %arg4[%c0_31, %c0_32] : memref<1x128xf32, #tpu.memory_space<vmem>>, vector<1x128xf32>
    %126 = vector.broadcast %125 : vector<1x128xf32> to vector<16x128xf32>
    %127 = arith.addf %124, %126 : vector<16x128xf32>
    %128 = vector.shape_cast %127 : vector<16x128xf32> to vector<2x8x128xf32>
    %c0_33 = arith.constant 0 : index
    %c0_34 = arith.constant 0 : index
    %c0_35 = arith.constant 0 : index
    %129 = vector.load %arg5[%c0_33, %c0_34, %c0_35] : memref<2x8x128xf32, #tpu.memory_space<vmem>>, vector<2x8x128xf32>
    tpu.vector_store %arg5[%c0_33, %c0_34, %c0_35], %128 {strides = array<i32>} : memref<2x8x128xf32, #tpu.memory_space<vmem>>, vector<2x8x128xf32>,
    return
  }
  func.func @transform_0(%arg0: i32) -> (i32, i32, i32) {
    %c0_i32 = arith.constant 0 : i32
    %c0_i32_0 = arith.constant 0 : i32
    %c0_i32_1 = arith.constant 0 : i32
    return %arg0, %c0_i32, %c0_i32_0 : i32, i32, i32
  }
  func.func @transform_1(%arg0: i32) -> (i32, i32) {
    %c0_i32 = arith.constant 0 : i32
    %c0_i32_0 = arith.constant 0 : i32
    %c0_i32_1 = arith.constant 0 : i32
    return %c0_i32, %c0_i32_0 : i32, i32
  }
  func.func @transform_2(%arg0: i32) -> (i32, i32) {
    %c0_i32 = arith.constant 0 : i32
    %c0_i32_0 = arith.constant 0 : i32
    %c0_i32_1 = arith.constant 0 : i32
    return %c0_i32, %c0_i32_0 : i32, i32
  }
  func.func @transform_3(%arg0: i32) -> (i32, i32) {
    %c0_i32 = arith.constant 0 : i32
    %c0_i32_0 = arith.constant 0 : i32
    %c0_i32_1 = arith.constant 0 : i32
    return %c0_i32, %c0_i32_0 : i32, i32
  }
  func.func @transform_4(%arg0: i32) -> (i32, i32, i32) {
    %c0_i32 = arith.constant 0 : i32
    %c0_i32_0 = arith.constant 0 : i32
    %c0_i32_1 = arith.constant 0 : i32
    return %arg0, %c0_i32, %c0_i32_0 : i32, i32, i32
  }
}

</mosaic_0001>

<bundles_post_ra>
// kernel: tpu_custom_call.1
= control target key start
LH: loop header
LB: loop body
LE: loop exit
PB: predicated region body
PF: predicated region fallthrough
CT: control target
= control target key end

     0   :  { %9 = vsyncpa [#allocation3], 0  ;;  %s1419_s0 = inlined_call_operand.hbm [shape: bf16[2,8,128], index: 0, kind: input, shape index: {}]   ;;  %s1420_s1 = inlined_call_operand.hbm [shape: bf16[128,384], index: 1, kind: input, shape index: {}]   ;;  %s1421_s2 = inlined_call_operand.hbm [shape: bf16[128,128], index: 2, kind: input, shape index: {}]   ;;  %s1422_s3 = inlined_call_operand.vmem [shape: f32[1,128], index: 3, kind: input, shape index: {}]   ;;  %s1423_s4 = inlined_call_operand.hbm [shape: f32[2,8,128], index: 4, kind: output, shape index: {}]  }
   0x1   :  { %10 = vsyncpa [#allocation6], 0  ;;  %s29_s17 = sshll.u32 %s1420_s1, 4  ;;  %s30_s17 = int_to_ptr.hbm [resolvable:$true] %s29_s17 }
   0x2   :  { %11 = vsyncpa [#allocation4], 0  ;;  %s1242_s18 = smov [#allocation5]   ;;  %s16_s22 = sshll.u32 %s1419_s0, 4  ;;  %s17_s22 = int_to_ptr.hbm [resolvable:$true] %s16_s22 }
   0x3   :  { %s31_s19 = sshll.u32 %s1242_s18, 4  ;;  %s1243_s23 = smov 192   ;;  %s32_s19 = int_to_ptr.vmem [resolvable:$true] %s31_s19 }
   0x4   :  { %s1244_s24 = smov 12   ;;  %s1245_s25 = smov [#allocation2]  }
   0x5   :  { %37 = dma.hbm_to_vmem [thread:$0]  %s30_s17, 3072, %s32_s19, [#allocation6], %s1243_s23, %s1243_s23, %s1244_s24  }
   0x6   :  { %s18_s26 = sshll.u32 %s1245_s25, 4  ;;  %s1246_s27 = smov 64   ;;  %s19_s26 = int_to_ptr.vmem [resolvable:$true] %s18_s26 }
   0x7   :  { %s1247_s28 = smov 4   ;;  %s42_s30 = sshll.u32 %s1421_s2, 4  ;;  %s43_s30 = int_to_ptr.hbm [resolvable:$true] %s42_s30 }
   0x8   :  { %24 = dma.hbm_to_vmem [thread:$0]  %s17_s22, 128, %s19_s26, [#allocation3], %s1246_s27, %s1246_s27, %s1247_s28  }
   0x9   :  { %s1248_s5 = smov [#allocation7]  }
   0xa   :  { %s44_s6 = sshll.u32 %s1248_s5, 4  ;;  %s45_s6 = int_to_ptr.vmem [resolvable:$true] %s44_s6 }
   0xb   :  { %50 = dma.hbm_to_vmem [thread:$0]  %s43_s30, 1024, %s45_s6, [#allocation6], %s1246_s27, %s1246_s27, %s1247_s28  }
   0xc   :  { %1236 = dma.done.wait [#allocation3], 128  }
   0xd   :  { %1237 = vsyncadd [#allocation3], 4294967168 }
   0xe   :  { %1238 = dma.done.wait [#allocation6], 4096  }
   0xf   :  { %1239 = vsyncadd [#allocation6], 4294963200  ;;  %v1069_v0 = vld [vmem:[#allocation5 + $0xac] sm:$0xf]  ;;  %v991_v1 = vld [vmem:[#allocation5 + $0xb4] sm:$0xf0] }
  0x10   :  { %v989_v2 = vld [vmem:[#allocation5 + $0xa8] sm:$0xf]  ;;  %v994_v3 = vor.u32 %v1069_v0, %v991_v1  ;;  %v1070_v4 = vld [vmem:[#allocation5 + $0xb0] sm:$0xf0]  ;;  %v979_v6 = vld [vmem:[#allocation5 + $0x9c] sm:$0xf0] }
  0x11   :  { %v1066_v5 = vld [vmem:[#allocation5 + $0x94] sm:$0xf]  ;;  %v990_v7 = vor.u32 %v1070_v4, %v989_v2  ;;  %v977_v8 = vld [vmem:[#allocation5 + $0x90] sm:$0xf]  ;;  %v1067_v9 = vld [vmem:[#allocation5 + $0x98] sm:$0xf0] }
  0x12   :  { %248 = vmatpush.bf16.msra.mxu1 %v994_v3  ;;  %v982_v10 = vor.u32 %v1066_v5, %v979_v6  ;;  %v978_v11 = vor.u32 %v1067_v9, %v977_v8  ;;  %v1063_v12 = vld [vmem:[#allocation5 + $0x7c] sm:$0xf]  ;;  %v967_v13 = vld [vmem:[#allocation5 + $0x84] sm:$0xf0]  ;;  %v965_v14 = vld [vmem:[#allocation5 + $0x78] sm:$0xf] }
  0x13   :  { %234 = vmatpush.bf16.msra.mxu0 %v990_v7  ;;  %v1064_v15 = vld [vmem:[#allocation5 + $0x80] sm:$0xf0]  ;;  %v970_v16 = vor.u32 %v1063_v12, %v967_v13  ;;  %v955_v19 = vld [vmem:[#allocation5 + $0x6c] sm:$0xf0]  ;;  %v953_v20 = vld [vmem:[#allocation5 + $0x60] sm:$0xf] }
  0x14   :  { %v966_v17 = vor.u32 %v1064_v15, %v965_v14  ;;  %v1060_v18 = vld [vmem:[#allocation5 + $0x64] sm:$0xf]  ;;  %v1061_v21 = vld [vmem:[#allocation5 + $0x68] sm:$0xf0]  ;;  %v943_v25 = vld [vmem:[#allocation5 + $0x54] sm:$0xf0] }
  0x15   :  { %v958_v22 = vor.u32 %v1060_v18, %v955_v19  ;;  %v954_v23 = vor.u32 %v1061_v21, %v953_v20  ;;  %v1057_v24 = vld [vmem:[#allocation5 + $0x4c] sm:$0xf]  ;;  %v941_v26 = vld [vmem:[#allocation5 + $0x48] sm:$0xf]  ;;  %v1058_v27 = vld [vmem:[#allocation5 + $0x50] sm:$0xf0] }
  0x16   :  { %249 = vmatpush.bf16.msra.mxu1 %v982_v10  ;;  %v946_v28 = vor.u32 %v1057_v24, %v943_v25  ;;  %v942_v29 = vor.u32 %v1058_v27, %v941_v26  ;;  %v1054_v30 = vld [vmem:[#allocation5 + $0x34] sm:$0xf]  ;;  %v931_v31 = vld [vmem:[#allocation5 + $0x3c] sm:$0xf0]  ;;  %v929_v32 = vld [vmem:[#allocation5 + $0x30] sm:$0xf] }
  0x17   :  { %235 = vmatpush.bf16.msra.mxu0 %v978_v11  ;;  %v1055_v33 = vld [vmem:[#allocation5 + $0x38] sm:$0xf0]  ;;  %v934_v34 = vor.u32 %v1054_v30, %v931_v31  ;;  %v919_v37 = vld [vmem:[#allocation5 + $0x24] sm:$0xf0]  ;;  %v917_v38 = vld [vmem:[#allocation5 + $0x18] sm:$0xf] }
  0x18   :  { %v930_v35 = vor.u32 %v1055_v33, %v929_v32  ;;  %v1051_v36 = vld [vmem:[#allocation5 + $0x1c] sm:$0xf]  ;;  %v1052_v39 = vld [vmem:[#allocation5 + $0x20] sm:$0xf0]  ;;  %v907_v43 = vld [vmem:[#allocation5 + $0xc] sm:$0xf0] }
  0x19   :  { %v922_v40 = vor.u32 %v1051_v36, %v919_v37  ;;  %v918_v41 = vor.u32 %v1052_v39, %v917_v38  ;;  %v1048_v42 = vld [vmem:[#allocation5 + $0x4] sm:$0xf]  ;;  %v905_v44 = vld [vmem:[#allocation5] sm:$0xf]  ;;  %v1049_v45 = vld [vmem:[#allocation5 + $0x8] sm:$0xf0]  ;;  %v276_v38 = vlaneseq }
  0x1a   :  { %250 = vmatpush.bf16.msra.mxu1 %v970_v16  ;;  %v910_v46 = vor.u32 %v1048_v42, %v907_v43  ;;  %v906_v47 = vor.u32 %v1049_v45, %v905_v44  ;;  %v1292_v48 = vld [vmem:[#allocation2] sm:$0xff]  ;;  %vm285_vm0 = vcmask 261120   ;;  %s1249_s0 = smov 96   ;;  %v997_v56 = vld [vmem:[#allocation5 + $0xb0] sm:$0xf]  ;;  %s1250_s2 = smov 32  }
  0x1b   :  { %236 = vmatpush.bf16.msra.mxu0 %v966_v17  ;;  %v1071_v57 = vld [vmem:[#allocation5 + $0xb8] sm:$0xf0]  ;;  %v985_v58 = vld [vmem:[#allocation5 + $0x98] sm:$0xf]  ;;  %v1068_v62 = vld [vmem:[#allocation5 + $0xa0] sm:$0xf0] }
  0x1c   :  { %v998_v61 = vor.u32 %v1071_v57, %v997_v56  ;;  %v986_v1 = vor.u32 %v1068_v62, %v985_v58  ;;  %v973_v4 = vld [vmem:[#allocation5 + $0x80] sm:$0xf]  ;;  %v1065_v5 = vld [vmem:[#allocation5 + $0x88] sm:$0xf0]  ;;  %v961_v10 = vld [vmem:[#allocation5 + $0x68] sm:$0xf] }
  0x1d   :  { %v974_v9 = vor.u32 %v1065_v5, %v973_v4  ;;  %v1062_v11 = vld [vmem:[#allocation5 + $0x70] sm:$0xf0]  ;;  %v949_v14 = vld [vmem:[#allocation5 + $0x50] sm:$0xf]  ;;  %v1059_v15 = vld [vmem:[#allocation5 + $0x58] sm:$0xf0] }
  0x1e   :  { %251 = vmatpush.bf16.msra.mxu1 %v958_v22  ;;  %262 = vmatpush.bf16.msra.mxu2 %v998_v61  ;;  %v962_v13 = vor.u32 %v1062_v11, %v961_v10  ;;  %v950_v17 = vor.u32 %v1059_v15, %v949_v14  ;;  %v937_v18 = vld [vmem:[#allocation5 + $0x38] sm:$0xf]  ;;  %v1056_v19 = vld [vmem:[#allocation5 + $0x40] sm:$0xf0]  ;;  %v925_v21 = vld [vmem:[#allocation5 + $0x20] sm:$0xf] }
  0x1f   :  { %237 = vmatpush.bf16.msra.mxu0 %v954_v23  ;;  %v938_v20 = vor.u32 %v1056_v19, %v937_v18  ;;  %v1053_v22 = vld [vmem:[#allocation5 + $0x28] sm:$0xf0]  ;;  %v913_v24 = vld [vmem:[#allocation5 + $0x8] sm:$0xf]  ;;  %v1050_v25 = vld [vmem:[#allocation5 + $0x10] sm:$0xf0] }
  0x20   :  { %v926_v23 = vor.u32 %v1053_v22, %v925_v21  ;;  %v914_v26 = vor.u32 %v1050_v25, %v913_v24  ;;  %v279_v42 = vand.u32 127, %v276_v38  ;;  %vm330_vm2 = vcmask 64512   ;;  %s1251_s9 = smov [#allocation8]   ;;  %s885_s13 = sshll.u32 %s1423_s4, 4  ;;  %s886_s13 = int_to_ptr.hbm [resolvable:$true] %s885_s13 }
  0x21   :  { %vm360_vm3 = vcmask 1043456   ;;  %vm788_vm4 = vcmask 523264   ;;  %vm791_vm5 = vcmask 785408   ;;  %s883_s10 = sshll.u32 %s1251_s9, 4  ;;  %s1252_s14 = smov 128   ;;  %s884_s10 = int_to_ptr.vmem [resolvable:$true] %s883_s10 }
  0x22   :  { %252 = vmatpush.bf16.msra.mxu1 %v946_v28  ;;  %263 = vmatpush.bf16.msra.mxu2 %v986_v1  ;;  %s1253_s15 = smov 8  }
  0x23   :  { %238 = vmatpush.bf16.msra.mxu0 %v942_v29 }
  0x26   :  { %253 = vmatpush.bf16.msra.mxu1 %v934_v34  ;;  %264 = vmatpush.bf16.msra.mxu2 %v974_v9 }
  0x27   :  { %239 = vmatpush.bf16.msra.mxu0 %v930_v35 }
  0x2a   :  { %254 = vmatpush.bf16.msra.mxu1 %v922_v40  ;;  %265 = vmatpush.bf16.msra.mxu2 %v962_v13 }
  0x2b   :  { %240 = vmatpush.bf16.msra.mxu0 %v918_v41  ;;  %v277_v41 = vshrl.u32 %v276_v38, 7 }
  0x2d   :  { %vm1320_vm1 = vcmp.le.s32.totalorder %v279_v42, %v277_v41 }
  0x2e   :  { %255 = vmatpush.bf16.msra.mxu1 %v910_v46  ;;  %266 = vmatpush.bf16.msra.mxu2 %v950_v17 }
  0x2f   :  { %241 = vmatpush.bf16.msra.mxu0 %v906_v47 }
  0x31   :  { %256 = vmatmul.bf16.vlgmr.msra.gmra.mxu1 %v1292_v48 }
  0x32   :  { %242 = vmatmul.bf16.vlgmr.msra.gmra.mxu0 %v1292_v48  ;;  %267 = vmatpush.bf16.msra.mxu2 %v938_v20 }
  0x36   :  { %268 = vmatpush.bf16.msra.mxu2 %v926_v23 }
  0x3a   :  { %269 = vmatpush.bf16.msra.mxu2 %v914_v26 }
  0x3d   :  { %270 = vmatmul.bf16.vlgmr.msra.gmra.mxu2 %v1292_v48 }
  0xae   :  { %v257_v49 = vpop.f32.mrf.mxu1 }
  0xaf   :  { %v283_v50 = vpack.c.bf16 %v257_v49, %v257_v49  ;;  %v243_v51 = vpop.f32.mrf.mxu0 }
  0xb0   :  { %v281_v54 = vpack.c.bf16 %v243_v51, %v243_v51 }
  0xb1   :  { %v402_v52 = vunpack.c.l.b16 %v283_v50  ;;  %v290_v53 = vsel %vm285_vm0, %v283_v50, 0 }
  0xb2   :  { %299 = vmatpush.bf16.xpose.msra.mxu3 %v290_v53  ;;  %v397_v59 = vunpack.c.l.b16 %v281_v54 }
  0xb3   :  { %v403_v55 = vpack.c.b16 %v402_v52, %v402_v52 }
  0xb4   :  { %v398_v6 = vpack.c.b16 %v397_v59, %v397_v59 }
  0xb5   :  { %532 = vrot.lane.b32.xlu2 %v403_v55, %s1246_s27  ;;  %404 = vrot.lane.b32.xlu0 %v403_v55, %s1249_s0 }
  0xb6   :  { %v259_v60 = vpop.f32.mrf.mxu1 }
  0xb7   :  { %v284_v63 = vpack.c.bf16 %v259_v60, %v259_v60  ;;  %v245_v0 = vpop.f32.mrf.mxu0 }
  0xb8   :  { %v282_v8 = vpack.c.bf16 %v245_v0, %v245_v0 }
  0xb9   :  { %v431_v2 = vunpack.c.l.b16 %v284_v63  ;;  %999 = vmatmul.msk.bf16.vlgmr.msra.gmra.mxu3 %vm285_vm0, %v281_v54  ;;  %v309_v3 = vsel %vm285_vm0, %v284_v63, 0 }
  0xba   :  { %318 = vmatpush.bf16.xpose.msrb.mxu3 %v309_v3  ;;  %v426_v12 = vunpack.c.l.b16 %v282_v8 }
  0xbb   :  { %v432_v7 = vpack.c.b16 %v431_v2, %v431_v2 }
  0xbc   :  { %v427_v16 = vpack.c.b16 %v426_v12, %v426_v12 }
  0xbd   :  { %555 = vrot.lane.b32.xlu2 %v432_v7, %s1246_s27  ;;  %433 = vrot.lane.b32.xlu1 %v432_v7, %s1249_s0 }
  0xbe   :  { %399 = vrot.lane.b32.xlu0 %v398_v6, %s1249_s0 }
  0xc0   :  { %v271_v59 = vpop.f32.mrf.mxu2 }
  0xc1   :  { %v355_v60 = vpack.c.bf16 %v271_v59, %v271_v59 }
  0xc3   :  { %v362_v61 = vsel %vm360_vm3, %v355_v60, 0  ;;  %v483_v62 = vunpack.c.l.b16 %v355_v60 }
  0xc4   :  { %371 = vmatpush.bf16.msra.mxu3 %v362_v61 }
  0xc5   :  { %648 = vrot.lane.b32.xlu2 %v403_v55, %s1250_s2  ;;  %428 = vrot.lane.b32.xlu1 %v427_v16, %s1249_s0  ;;  %v1336_v63 = vpack.c.b16 %v483_v62, %v483_v62 }
  0xc6   :  { %530 = vrot.lane.b32.xlu0 %v398_v6, %s1246_s27 }
  0xc8   :  { %v273_v0 = vpop.f32.mrf.mxu2 }
  0xc9   :  { %1000 = vmatmul.msk.bf16.vlgmr.msrb.gmra.mxu3 %vm285_vm0, %v282_v8  ;;  %v356_v1 = vpack.c.bf16 %v273_v0, %v273_v0 }
  0xcb   :  { %v381_v2 = vsel %vm360_vm3, %v356_v1, 0 }
  0xcc   :  { %390 = vmatpush.bf16.msrb.mxu0 %v381_v2 }
  0xcd   :  { %669 = vrot.lane.b32.xlu2 %v427_v16, %s1250_s2  ;;  %553 = vrot.lane.b32.xlu1 %v427_v16, %s1246_s27 }
  0xce   :  { %671 = vrot.lane.b32.xlu0 %v432_v7, %s1250_s2 }
  0xd5   :  { %646 = vrot.lane.b32.xlu1 %v398_v6, %s1250_s2 }
 0x10f   :  { %v533_v27 = vpop.permute.xlu2 %532 }
 0x110   :  { %v538_v28 = vsel %vm285_vm0, %v533_v27, 0 }
 0x111   :  { %547 = vmatpush.bf16.xpose.msrb.mxu1 %v538_v28 }
 0x117   :  { %v556_v29 = vpop.permute.xlu2 %555 }
 0x118   :  { %v561_v37 = vsel %vm285_vm0, %v556_v29, 0 }
 0x11f   :  { %v649_v30 = vpop.permute.xlu2 %648 }
 0x120   :  { %v654_v31 = vsel %vm285_vm0, %v649_v30, 0 }
 0x121   :  { %663 = vmatpush.bf16.xpose.msra.mxu1 %v654_v31  ;;  %v507_v31 = vunpack.c.l.b16 %v356_v1 }
 0x127   :  { %v405_v32 = vpop.permute.xlu0 %404  ;;  %v670_v58 = vpop.permute.xlu2 %669 }
 0x128   :  { %v410_v33 = vsel %vm285_vm0, %v405_v32, 0 }
 0x129   :  { %419 = vmatpush.bf16.xpose.msrb.mxu2 %v410_v33 }
 0x12f   :  { %v434_v34 = vpop.permute.xlu1 %433 }
 0x130   :  { %v439_v35 = vsel %vm285_vm0, %v434_v34, 0  ;;  %v400_v36 = vpop.permute.xlu0 %399  ;;  %v1356_v34 = vpack.c.b16 %v507_v31, %v507_v31 }
 0x131   :  { %1003 = vmatmul.msk.bf16.vlgmr.msrb.gmra.mxu2 %vm285_vm0, %v400_v36 }
 0x132   :  { %448 = vmatpush.bf16.xpose.msra.mxu2 %v439_v35 }
 0x137   :  { %v429_v39 = vpop.permute.xlu1 %428 }
 0x138   :  { %v531_v40 = vpop.permute.xlu0 %530 }
 0x139   :  { %1007 = vmatmul.msk.bf16.vlgmr.msrb.gmra.mxu1 %vm285_vm0, %v531_v40 }
 0x13a   :  { %570 = vmatpush.bf16.xpose.msrb.mxu2 %v561_v37 }
 0x13c   :  { %v301_v43 = vpop.f32.mrf.mxu3 }
 0x13d   :  { %v324_v45 = vmul.f32 0.088388346, %v301_v43 }
 0x13f   :  { %v554_v46 = vpop.permute.xlu1 %553  ;;  %v328_v47 = vsel %vm1320_vm1, %v324_v45, -1e+30 }
 0x140   :  { %v672_v48 = vpop.permute.xlu0 %671  ;;  %v331_v49 = vsel %vm330_vm2, %v328_v47, -inf }
 0x141   :  { %v677_v50 = vsel %vm285_vm0, %v672_v48, 0  ;;  %1004 = vmatmul.msk.bf16.vlgmr.msra.gmra.mxu2 %vm285_vm0, %v429_v39  ;;  %332 = vmax.xlane.f32.xlu0 %v331_v49 }
 0x142   :  { %686 = vmatpush.bf16.xpose.msra.mxu2 %v677_v50 }
 0x144   :  { %v303_v51 = vpop.f32.mrf.mxu3 }
 0x147   :  { %v647_v52 = vpop.permute.xlu1 %646 }
 0x149   :  { %1011 = vmatmul.msk.bf16.vlgmr.msra.gmra.mxu1 %vm285_vm0, %v647_v52 }
 0x14c   :  { %v320_v53 = vpop.f32.mrf.mxu3 }
 0x14d   :  { %v325_v54 = vmul.f32 0.088388346, %v320_v53 }
 0x14f   :  { %v329_v55 = vsel %vm1320_vm1, %v325_v54, -1e+30 }
 0x150   :  { %v334_v56 = vsel %vm330_vm2, %v329_v55, -inf }
 0x151   :  { %1008 = vmatmul.msk.bf16.vlgmr.msrb.gmra.mxu2 %vm285_vm0, %v554_v46  ;;  %335 = vmax.xlane.f32.xlu1 %v334_v56 }
 0x154   :  { %v322_v57 = vpop.f32.mrf.mxu3 }
 0x161   :  { %1012 = vmatmul.msk.bf16.vlgmr.msra.gmra.mxu2 %vm285_vm0, %v670_v58 }
 0x16a   :  { %604 = vrot.lane.b32.xlu1 %v1336_v63, %s1246_s27 }
 0x1b4   :  { %v421_v3 = vpop.f32.mrf.mxu2  ;;  %v333_v4 = vpop.xlane.xlu0 %332 }
 0x1b5   :  { %v454_v5 = vmul.f32 0.088388346, %v421_v3  ;;  %v337_v6 = vsub.f32 %v328_v47, %v333_v4 }
 0x1b6   :  { %v549_v7 = vpop.f32.mrf.mxu1 }
 0x1b7   :  { %v339_v8 = vmul.f32 1.442695, %v337_v6  ;;  %v576_v9 = vmul.f32 0.088388346, %v549_v7  ;;  %v456_v10 = vsel %vm1320_vm1, %v454_v5, -1e+30 }
 0x1b8   :  { %v458_v11 = vsel %vm330_vm2, %v456_v10, -inf }
 0x1b9   :  { %1108 = vpow2.f32 %v339_v8  ;;  %459 = vmax.xlane.f32.xlu2 %v458_v11  ;;  %v578_v12 = vsel %vm1320_vm1, %v576_v9, -1e+30 }
 0x1ba   :  { %v580_v13 = vsel %vm330_vm2, %v578_v12, -inf }
 0x1bb   :  { %581 = vmax.xlane.f32.xlu0 %v580_v13 }
 0x1bc   :  { %v423_v14 = vpop.f32.mrf.mxu2 }
 0x1be   :  { %v551_v15 = vpop.f32.mrf.mxu1 }
 0x1bf   :  { %v1109_v16 = vpop.eup %1108 }
 0x1c0   :  { %v343_v17 = vsel %vm330_vm2, %v1109_v16, 0.0 }
 0x1c3   :  { %344 = vadd.xlane.f32.xlu0 %v343_v17 }
 0x1c4   :  { %v450_v18 = vpop.f32.mrf.mxu2  ;;  %v336_v19 = vpop.xlane.xlu1 %335 }
 0x1c5   :  { %v455_v20 = vmul.f32 0.088388346, %v450_v18  ;;  %v338_v22 = vsub.f32 %v329_v55, %v336_v19 }
 0x1c6   :  { %v665_v21 = vpop.f32.mrf.mxu1 }
 0x1c7   :  { %v457_v23 = vsel %vm1320_vm1, %v455_v20, -1e+30  ;;  %v692_v25 = vmul.f32 0.088388346, %v665_v21  ;;  %v341_v26 = vmul.f32 1.442695, %v338_v22 }
 0x1c8   :  { %v461_v24 = vsel %vm330_vm2, %v457_v23, -inf }
 0x1c9   :  { %462 = vmax.xlane.f32.xlu2 %v461_v24  ;;  %v694_v28 = vsel %vm1320_vm1, %v692_v25, -1e+30  ;;  %1110 = vpow2.f32 %v341_v26 }
 0x1ca   :  { %v696_v30 = vsel %vm330_vm2, %v694_v28, -inf }
 0x1cc   :  { %v452_v27 = vpop.f32.mrf.mxu2 }
 0x1ce   :  { %v667_v29 = vpop.f32.mrf.mxu1 }
 0x1cf   :  { %v1354_v33 = vpop.eup %1110 }
 0x1d0   :  { %v346_v38 = vsel %vm330_vm2, %v1354_v33, 0.0 }
 0x1d1   :  { %697 = vmax.xlane.f32.xlu2 %v696_v30 }
 0x1d4   :  { %v572_v32 = vpop.f32.mrf.mxu2 }
 0x1d5   :  { %v577_v35 = vmul.f32 0.088388346, %v572_v32 }
 0x1d7   :  { %509 = vrot.lane.b32.xlu0 %v1356_v34, %s1249_s0  ;;  %v579_v36 = vsel %vm1320_vm1, %v577_v35, -1e+30 }
 0x1d8   :  { %v583_v37 = vsel %vm330_vm2, %v579_v36, -inf }
 0x1d9   :  { %584 = vmax.xlane.f32.xlu1 %v583_v37  ;;  %347 = vadd.xlane.f32.xlu2 %v346_v38 }
 0x1dc   :  { %v574_v39 = vpop.f32.mrf.mxu2  ;;  %v605_v62 = vpop.permute.xlu1 %604 }
 0x1dd   :  { %v610_v17 = vsel %vm360_vm3, %v605_v62, 0 }
 0x1e4   :  { %v688_v40 = vpop.f32.mrf.mxu2 }
 0x1e5   :  { %v693_v41 = vmul.f32 0.088388346, %v688_v40 }
 0x1e7   :  { %v1367_v42 = vsel %vm1320_vm1, %v693_v41, -1e+30 }
 0x1e8   :  { %v699_v43 = vsel %vm330_vm2, %v1367_v42, -inf }
 0x1e9   :  { %700 = vmax.xlane.f32.xlu1 %v699_v43 }
 0x1ec   :  { %v690_v45 = vpop.f32.mrf.mxu2 }
 0x1f1   :  { %485 = vrot.lane.b32.xlu2 %v1336_v63, %s1249_s0 }
 0x22c   :  { %v460_v46 = vpop.xlane.xlu2 %459 }
 0x22d   :  { %v464_v47 = vsub.f32 %v456_v10, %v460_v46 }
 0x22e   :  { %v582_v48 = vpop.xlane.xlu0 %581 }
 0x22f   :  { %v466_v49 = vmul.f32 1.442695, %v464_v47  ;;  %v586_v50 = vsub.f32 %v578_v12, %v582_v48 }
 0x231   :  { %1112 = vpow2.f32 %v466_v49  ;;  %v588_v51 = vmul.f32 1.442695, %v586_v50 }
 0x233   :  { %1114 = vpow2.f32 %v588_v51 }
 0x236   :  { %v345_v52 = vpop.xlane.xlu0 %344 }
 0x237   :  { %v1113_v44 = vpop.eup %1112  ;;  %1116 = vrcp.f32 %v345_v52 }
 0x238   :  { %v470_v53 = vsel %vm330_vm2, %v1113_v44, 0.0 }
 0x239   :  { %v1374_v54 = vpop.eup %1114  ;;  %471 = vadd.xlane.f32.xlu0 %v470_v53 }
 0x23a   :  { %v592_v55 = vsel %vm330_vm2, %v1374_v54, 0.0 }
 0x23b   :  { %593 = vadd.xlane.f32.xlu1 %v592_v55 }
 0x23c   :  { %v463_v56 = vpop.xlane.xlu2 %462 }
 0x23d   :  { %v1117_v57 = vpop.eup %1116  ;;  %v465_v58 = vsub.f32 %v457_v23, %v463_v56 }
 0x23e   :  { %v351_v59 = vmul.f32 %v1117_v57, %v1109_v16 }
 0x23f   :  { %v468_v60 = vmul.f32 1.442695, %v465_v58 }
 0x240   :  { %v353_v61 = vpack.c.bf16 %v351_v59, %v351_v59 }
 0x241   :  { %1118 = vpow2.f32 %v468_v60 }
 0x242   :  { %1001 = vmatmul.msk.bf16.vlgmr.msra.gmra.mxu3 %vm330_vm2, %v353_v61 }
 0x244   :  { %v698_v0 = vpop.xlane.xlu2 %697 }
 0x245   :  { %v702_v1 = vsub.f32 %v694_v28, %v698_v0 }
 0x247   :  { %v1119_v2 = vpop.eup %1118  ;;  %v704_v3 = vmul.f32 1.442695, %v702_v1 }
 0x248   :  { %v473_v4 = vsel %vm330_vm2, %v1119_v2, 0.0 }
 0x249   :  { %1120 = vpow2.f32 %v704_v3  ;;  %v510_v5 = vpop.permute.xlu0 %509  ;;  %474 = vadd.xlane.f32.xlu1 %v473_v4 }
 0x24a   :  { %v515_v6 = vsel %vm360_vm3, %v510_v5, 0 }
 0x24b   :  { %524 = vmatpush.bf16.msra.mxu0 %v515_v6 }
 0x24c   :  { %v348_v7 = vpop.xlane.xlu2 %347  ;;  %v585_v8 = vpop.xlane.xlu1 %584 }
 0x24d   :  { %1122 = vrcp.f32 %v348_v7  ;;  %v587_v9 = vsub.f32 %v579_v36, %v585_v8  ;;  %625 = vrot.lane.b32.xlu0 %v1356_v34, %s1246_s27 }
 0x24f   :  { %v1121_v10 = vpop.eup %1120  ;;  %v590_v11 = vmul.f32 1.442695, %v587_v9 }
 0x250   :  { %v708_v12 = vsel %vm330_vm2, %v1121_v10, 0.0 }
 0x251   :  { %1124 = vpow2.f32 %v590_v11  ;;  %709 = vadd.xlane.f32.xlu2 %v708_v12  ;;  %v1079_v11 = vld [vmem:[#allocation7 + $0x38] sm:$0xff]  ;;  %v1078_v12 = vld [vmem:[#allocation7 + $0x30] sm:$0xff] }
 0x252   :  { %863 = vmatpush.bf16.msrb.mxu1 %v1079_v11 }
 0x253   :  { %v1123_v13 = vpop.eup %1122 }
 0x254   :  { %v352_v14 = vmul.f32 %v1123_v13, %v1354_v33  ;;  %v486_v15 = vpop.permute.xlu2 %485  ;;  %v1077_v13 = vld [vmem:[#allocation7 + $0x28] sm:$0xff] }
 0x255   :  { %v491_v16 = vsel %vm360_vm3, %v486_v15, 0  ;;  %v1075_v15 = vld [vmem:[#allocation7 + $0x18] sm:$0xff] }
 0x256   :  { %500 = vmatpush.bf16.msrb.mxu3 %v491_v16  ;;  %v354_v18 = vpack.c.bf16 %v352_v14, %v352_v14  ;;  %864 = vmatpush.bf16.msrb.mxu1 %v1078_v12  ;;  %v1076_v14 = vld [vmem:[#allocation7 + $0x20] sm:$0xff]  ;;  %v1074_v16 = vld [vmem:[#allocation7 + $0x10] sm:$0xff] }
 0x257   :  { %v1125_v19 = vpop.eup %1124 }
 0x258   :  { %1002 = vmatmul.msk.bf16.vlgmr.msrb.gmra.mxu0 %vm330_vm2, %v354_v18  ;;  %v595_v20 = vsel %vm330_vm2, %v1125_v19, 0.0  ;;  %v1072_v18 = vld [vmem:[#allocation7] sm:$0xff] }
 0x259   :  { %596 = vadd.xlane.f32.xlu1 %v595_v20 }
 0x25a   :  { %619 = vmatpush.bf16.msra.mxu3 %v610_v17  ;;  %865 = vmatpush.bf16.msrb.mxu1 %v1077_v13  ;;  %v1073_v17 = vld [vmem:[#allocation7 + $0x8] sm:$0xff] }
 0x25c   :  { %v701_v21 = vpop.xlane.xlu1 %700 }
 0x25d   :  { %v703_v22 = vsub.f32 %v1367_v42, %v701_v21 }
 0x25e   :  { %866 = vmatpush.bf16.msrb.mxu1 %v1076_v14 }
 0x25f   :  { %v706_v23 = vmul.f32 1.442695, %v703_v22 }
 0x261   :  { %1126 = vpow2.f32 %v706_v23 }
 0x262   :  { %867 = vmatpush.bf16.msrb.mxu1 %v1075_v15 }
 0x266   :  { %868 = vmatpush.bf16.msrb.mxu1 %v1074_v16 }
 0x267   :  { %v1127_v24 = vpop.eup %1126 }
 0x268   :  { %v711_v25 = vsel %vm330_vm2, %v1127_v24, 0.0 }
 0x26a   :  { %869 = vmatpush.bf16.msrb.mxu1 %v1073_v17 }
 0x26e   :  { %870 = vmatpush.bf16.msrb.mxu1 %v1072_v18 }
 0x272   :  { %720 = vrot.lane.b32.xlu1 %v1336_v63, %s1250_s2 }
 0x277   :  { %712 = vadd.xlane.f32.xlu0 %v711_v25 }
 0x27a   :  { %741 = vrot.lane.b32.xlu1 %v1356_v34, %s1250_s2 }
 0x2ac   :  { %v472_v26 = vpop.xlane.xlu0 %471 }
 0x2ad   :  { %1128 = vrcp.f32 %v472_v26 }
 0x2ae   :  { %v594_v29 = vpop.xlane.xlu1 %593 }
 0x2af   :  { %1130 = vrcp.f32 %v594_v29 }
 0x2b3   :  { %v1129_v27 = vpop.eup %1128 }
 0x2b4   :  { %v478_v28 = vmul.f32 %v1129_v27, %v1113_v44 }
 0x2b5   :  { %v1131_v32 = vpop.eup %1130 }
 0x2b6   :  { %v480_v30 = vpack.c.bf16 %v478_v28, %v478_v28  ;;  %v600_v35 = vmul.f32 %v1131_v32, %v1374_v54 }
 0x2b8   :  { %1005 = vmatmul.msk.bf16.vlgmr.msrb.gmra.mxu3 %vm330_vm2, %v480_v30  ;;  %v602_v38 = vpack.c.bf16 %v600_v35, %v600_v35  ;;  %v1107_v35 = vld [vmem:[%s1422_s3] ss:$0 sm:$0xff] }
 0x2bc   :  { %v475_v31 = vpop.xlane.xlu1 %474 }
 0x2bd   :  { %1132 = vrcp.f32 %v475_v31 }
 0x2bf   :  { %v626_v63 = vpop.permute.xlu0 %625 }
 0x2c0   :  { %v631_v33 = vsel %vm360_vm3, %v626_v63, 0 }
 0x2c1   :  { %640 = vmatpush.bf16.msrb.mxu0 %v631_v33 }
 0x2c3   :  { %v1133_v36 = vpop.eup %1132 }
 0x2c4   :  { %v479_v34 = vmul.f32 %v1133_v36, %v1119_v2  ;;  %v710_v47 = vpop.xlane.xlu2 %709 }
 0x2c5   :  { %v1398_v37 = vpop.f32.mrf.mxu3 }
 0x2c6   :  { %v481_v39 = vpack.c.bf16 %v479_v34, %v479_v34 }
 0x2c8   :  { %1006 = vmatmul.msk.bf16.vlgmr.msra.gmra.mxu0 %vm330_vm2, %v481_v39  ;;  %1009 = vmatmul.msk.bf16.vlgmr.msra.gmra.mxu3 %vm330_vm2, %v602_v38 }
 0x2cc   :  { %v597_v40 = vpop.xlane.xlu1 %596 }
 0x2cd   :  { %1134 = vrcp.f32 %v597_v40  ;;  %v375_v41 = vpop.f32.mrf.mxu3 }
 0x2ce   :  { %1136 = vrcp.f32 %v710_v47 }
 0x2d3   :  { %v1135_v42 = vpop.eup %1134 }
 0x2d4   :  { %v601_v43 = vmul.f32 %v1135_v42, %v1125_v19  ;;  %v1137_v49 = vpop.eup %1136 }
 0x2d5   :  { %v392_v45 = vpop.f32.mrf.mxu0  ;;  %v716_v50 = vmul.f32 %v1137_v49, %v1121_v10 }
 0x2d6   :  { %v603_v46 = vpack.c.bf16 %v601_v43, %v601_v43 }
 0x2d7   :  { %v718_v44 = vpack.c.bf16 %v716_v50, %v716_v50 }
 0x2d8   :  { %1010 = vmatmul.msk.bf16.vlgmr.msrb.gmra.mxu0 %vm330_vm2, %v603_v46 }
 0x2dd   :  { %v394_v48 = vpop.f32.mrf.mxu0 }
 0x2e4   :  { %v721_v51 = vpop.permute.xlu1 %720 }
 0x2e5   :  { %v726_v52 = vsel %vm360_vm3, %v721_v51, 0 }
 0x2e6   :  { %735 = vmatpush.bf16.msrb.mxu3 %v726_v52 }
 0x2e9   :  { %1013 = vmatmul.msk.bf16.vlgmr.msrb.gmra.mxu3 %vm330_vm2, %v718_v44 }
 0x2ea   :  { %v713_v53 = vpop.xlane.xlu0 %712 }
 0x2eb   :  { %1138 = vrcp.f32 %v713_v53 }
 0x2ec   :  { %v742_v54 = vpop.permute.xlu1 %741 }
 0x2ed   :  { %v747_v55 = vsel %vm360_vm3, %v742_v54, 0 }
 0x2ee   :  { %756 = vmatpush.bf16.msra.mxu0 %v747_v55 }
 0x2f1   :  { %v1139_v56 = vpop.eup %1138 }
 0x2f2   :  { %v717_v57 = vmul.f32 %v1139_v56, %v1127_v24 }
 0x2f4   :  { %v719_v58 = vpack.c.bf16 %v717_v57, %v717_v57 }
 0x2f6   :  { %1014 = vmatmul.msk.bf16.vlgmr.msra.gmra.mxu0 %vm330_vm2, %v719_v58 }
 0x33b   :  { %v502_v59 = vpop.f32.mrf.mxu3 }
 0x343   :  { %v504_v60 = vpop.f32.mrf.mxu3 }
 0x345   :  { %v526_v61 = vpop.f32.mrf.mxu0 }
 0x346   :  { %v1092_v62 = vpack.i.bf16 %v526_v61, %v502_v59 }
 0x348   :  { %1093 = vrot.lane.b32.xlu1 %v1092_v62, %s1250_s2 }
 0x34b   :  { %v621_v0 = vpop.f32.mrf.mxu3 }
 0x34d   :  { %v528_v1 = vpop.f32.mrf.mxu0 }
 0x353   :  { %v623_v2 = vpop.f32.mrf.mxu3 }
 0x355   :  { %v642_v3 = vpop.f32.mrf.mxu0 }
 0x356   :  { %v1097_v4 = vpack.i.bf16 %v642_v3, %v621_v0 }
 0x358   :  { %1098 = vrot.lane.b32.xlu2 %v1097_v4, %s1246_s27 }
 0x35d   :  { %v644_v5 = vpop.f32.mrf.mxu0 }
 0x36c   :  { %v737_v6 = vpop.f32.mrf.mxu3 }
 0x373   :  { %v758_v7 = vpop.f32.mrf.mxu0 }
 0x374   :  { %v1102_v8 = vpack.i.bf16 %v758_v7, %v737_v6  ;;  %v739_v9 = vpop.f32.mrf.mxu3 }
 0x376   :  { %1103 = vrot.lane.b32.xlu1 %v1102_v8, %s1249_s0 }
 0x37b   :  { %v760_v10 = vpop.f32.mrf.mxu0 }
 0x3b2   :  { %v1099_v22 = vpop.permute.xlu2 %1098 }
 0x3b3   :  { %v1101_v25 = vunpack.i.h.bf16 %v1099_v22  ;;  %v1100_v26 = vunpack.i.l.bf16 %v1099_v22 }
 0x3ba   :  { %v1094_v19 = vpop.permute.xlu1 %1093 }
 0x3bb   :  { %v1096_v20 = vunpack.i.h.bf16 %v1094_v19  ;;  %v1095_v21 = vunpack.i.l.bf16 %v1094_v19 }
 0x3bd   :  { %v787_v23 = vsel %vm285_vm0, %v392_v45, %v1096_v20  ;;  %v786_v24 = vsel %vm285_vm0, %v1398_v37, %v1095_v21 }
 0x3be   :  { %v789_v30 = vsel %vm788_vm4, %v786_v24, %v1100_v26  ;;  %v790_v31 = vsel %vm788_vm4, %v787_v23, %v1101_v25 }
 0x3e8   :  { %v1104_v27 = vpop.permute.xlu1 %1103 }
 0x3e9   :  { %v1106_v28 = vunpack.i.h.bf16 %v1104_v27  ;;  %v1105_v29 = vunpack.i.l.bf16 %v1104_v27 }
 0x3eb   :  { %v793_v32 = vsel %vm791_vm5, %v790_v31, %v1106_v28  ;;  %v792_v63 = vsel %vm791_vm5, %v789_v30, %v1105_v29 }
 0x3ec   :  { %v794_v33 = vpack.c.bf16 %v793_v32, %v792_v63 }
 0x3ee   :  { %871 = vmatmul.bf16.vlgmr.msrb.gmra.mxu1 %v794_v33 }
 0x46b   :  { %v872_v36 = vpop.f32.mrf.mxu1 }
 0x46c   :  { %v873_v34 = vadd.f32 %v1107_v35, %v872_v36 }
 0x46e   :  { %877 = vst [vmem:[#allocation8] sm:$0xff] %v873_v34 }
 0x473   :  { %v874_v37 = vpop.f32.mrf.mxu1 }
 0x474   :  { %v875_v38 = vadd.f32 %v1107_v35, %v874_v37 }
 0x476   :  { %878 = vst [vmem:[#allocation8 + $0x8] sm:$0xff] %v875_v38 }
 0x477   :  { %891 = dma.vmem_to_hbm [thread:$0]  %s884_s10, 256, %s886_s13, [#allocation4], %s1252_s14, %s1252_s14, %s1253_s15  }
 0x478   :  { %1240 = dma.done.wait [#allocation4], 256  }
 0x479   :  { %1241 = vsyncadd [#allocation4], 4294967040 }
 0x47a   :  { %896 = vsyncpa [#allocation3], 1 }
 0x47b   :  { %897 = vsyncpa [#allocation6], 1 }
 0x47c   :  { %898 = vsyncpa [#allocation4], 1 }

</bundles_post_ra>
